<compile_context>
chip_gen: v6e
topology: v6e:2x2x1
jax: 0.10.0
libtpu: 0.0.40
codegen_flags: <defaults>
</compile_context>

<pallas_src>
import functools

import jax
import jax.numpy as jnp
from jax.experimental import pallas as pl
from jax.experimental.pallas import tpu as pltpu

EPS = 1e-5
LANE = 128


def fizzbuzz_kernel(x_ref, vec_ref, w_in_ref, w_h_ref, w_out_ref, o_ref, *,
                    n_hidden_layers, hidden, use_bf16_matmul):
    L = n_hidden_layers
    H = hidden
    out_pad = o_ref.shape[1]
    mm_dtype = jnp.bfloat16 if use_bf16_matmul else jnp.float32

    def mm(a, b):
        # Downcast only the MXU operands; accumulation and all elementwise
        # (BN/ReLU) math stays f32.
        return jnp.dot(a.astype(mm_dtype), b.astype(mm_dtype),
                       preferred_element_type=jnp.float32)

    # Packed per-feature vector rows (one operand -> one prologue DMA):
    #   row 0               : input-layer bias       (width H)
    #   rows 1    .. L      : hidden Linear biases   (width H)
    #   rows 1+L  .. 2L     : BN gammas              (width H)
    #   rows 1+2L .. 3L     : BN betas               (width H)
    #   row  1+3L           : output bias            (lane-padded, width out_pad)
    b_in = vec_ref[0:1, :H]                                  # (1, H) row slice

    # ---- input layer + ReLU -------------------------------------------------
    h = jnp.maximum(mm(x_ref[...], w_in_ref[...]) + b_in, 0.0)

    # ---- hidden stack: Linear -> BatchNorm1d(batch stats) -> ReLU ------------
    for l in range(L):                                       # tiny static unroll
        b_l    = vec_ref[1 + l:         2 + l,         :H]   # (1, H) rows;
        g_l    = vec_ref[1 + L + l:     2 + L + l,     :H]   # no [None, :]
        beta_l = vec_ref[1 + 2*L + l:   2 + 2*L + l,   :H]   # reshape per layer

        h_mm = h.astype(mm_dtype)                            # one cast per layer
        z = jnp.dot(h_mm, w_h_ref[l].astype(mm_dtype),
                    preferred_element_type=jnp.float32) + b_l
        mean = jnp.mean(z, axis=0, keepdims=True)            # sublane (XLU) reduce
        var = jnp.mean((z - mean) ** 2, axis=0, keepdims=True)  # biased, 2-pass
        s = g_l * jax.lax.rsqrt(var + EPS)                   # rsqrt -> EUP slot
        t = beta_l - mean * s
        h = jnp.maximum(z * s + t, 0.0)                      # fused scale/shift/relu

    # ---- output layer (lane-padded, no activation) ----------------------------
    b_out = vec_ref[1 + 3*L: 2 + 3*L, :out_pad]
    o_ref[...] = mm(h, w_out_ref[...]) + b_out


def pack_params(params, *, n_hidden_layers):
    """One-time packing: pad the output projection to a lane-dense width and
    stack every per-feature vector into a single (2+3L, W) array. Runs OFF the
    forward critical path."""
    (w_in, b_in, w_h, b_h, g, beta, w_out, b_out) = params
    hidden = w_in.shape[1]
    out_classes = w_out.shape[1]
    out_pad = max(LANE, pl.cdiv(out_classes, LANE) * LANE)
    W = max(hidden, out_pad)
    L = n_hidden_layers

    w_out_p = jnp.zeros((hidden, out_pad), jnp.float32).at[:, :out_classes].set(w_out)

    vecs = jnp.zeros((2 + 3 * L, W), jnp.float32)
    vecs = vecs.at[0, :hidden].set(b_in.reshape(-1))
    vecs = vecs.at[1:1 + L, :hidden].set(b_h)
    vecs = vecs.at[1 + L:1 + 2 * L, :hidden].set(g)
    vecs = vecs.at[1 + 2 * L:1 + 3 * L, :hidden].set(beta)
    vecs = vecs.at[1 + 3 * L, :out_classes].set(b_out.reshape(-1))

    return (vecs, w_in, w_h, w_out_p), out_classes


def fizzbuzz_forward(x, packed_params, *, n_hidden_layers, out_classes):
    vecs, w_in, w_h, w_out_p = packed_params
    batch, in_features = x.shape
    hidden = w_in.shape[1]
    out_pad = w_out_p.shape[1]

    # v5e's MXU is 128x128 bf16: once the contraction dim reaches 128, bf16
    # operands cut MXU passes. Elementwise math stays f32 inside the kernel.
    use_bf16_matmul = hidden >= 128

    flops = 2 * batch * (in_features * hidden
                         + n_hidden_layers * hidden * hidden
                         + hidden * out_pad)
    transcendentals = n_hidden_layers * hidden               # rsqrt per lane/layer
    operands = (x, vecs, w_in, w_h, w_out_p)
    bytes_accessed = (sum(int(a.size) * a.dtype.itemsize for a in operands)
                      + batch * out_pad * 4)

    vmem = pl.BlockSpec(memory_space=pltpu.MemorySpace.VMEM)
    kernel = functools.partial(fizzbuzz_kernel,
                               n_hidden_layers=n_hidden_layers,
                               hidden=hidden,
                               use_bf16_matmul=use_bf16_matmul)

    out = pl.pallas_call(
        kernel,
        out_shape=jax.ShapeDtypeStruct((batch, out_pad), jnp.float32),
        in_specs=[vmem] * 5,
        out_specs=vmem,
        cost_estimate=pl.CostEstimate(flops=flops,
                                      transcendentals=transcendentals,
                                      bytes_accessed=bytes_accessed),
    )(x, vecs, w_in, w_h, w_out_p)
    return out[:, :out_classes]


def init_params(key, in_features, out_classes, hidden_size, n_hidden_layers):
    ks = jax.random.split(key, 6)

    def uniform(k, shape, fan_in):
        bound = 1.0 / jnp.sqrt(jnp.float32(fan_in))
        return jax.random.uniform(k, shape, jnp.float32, -bound, bound)

    # Linear weights stored as (in, out) so the kernel does x @ W.
    w_in = uniform(ks[0], (in_features, hidden_size), in_features)
    b_in = uniform(ks[1], (1, hidden_size), in_features)
    w_h = uniform(ks[2], (n_hidden_layers, hidden_size, hidden_size), hidden_size)
    b_h = uniform(ks[3], (n_hidden_layers, hidden_size), hidden_size)
    g = jnp.ones((n_hidden_layers, hidden_size), jnp.float32)       # BN gamma
    beta = jnp.zeros((n_hidden_layers, hidden_size), jnp.float32)   # BN beta
    w_out = uniform(ks[4], (hidden_size, out_classes), hidden_size)
    b_out = uniform(ks[5], (1, out_classes), hidden_size)
    return (w_in, b_in, w_h, b_h, g, beta, w_out, b_out)


def reference_forward(x, params, *, n_hidden_layers):
    (w_in, b_in, w_h, b_h, g, beta, w_out, b_out) = params
    h = jnp.maximum(x @ w_in + b_in, 0.0)
    for l in range(n_hidden_layers):
        z = h @ w_h[l] + b_h[l][None, :]
        mean = jnp.mean(z, axis=0, keepdims=True)
        var = jnp.mean((z - mean) ** 2, axis=0, keepdims=True)
        zn = (z - mean) / jnp.sqrt(var + EPS)
        h = jnp.maximum(zn * g[l][None, :] + beta[l][None, :], 0.0)
    return h @ w_out + b_out


if __name__ == "__main__":
    in_features = 16
    out_classes = 4
    hidden_size = 32
    n_hidden_layers = 2
    batch = 8

    key = jax.random.PRNGKey(0)
    kx, kp = jax.random.split(key)
    x = jax.random.normal(kx, (batch, in_features), jnp.float32)
    params = init_params(kp, in_features, out_classes, hidden_size,
                         n_hidden_layers)
    packed, out_classes_packed = pack_params(params,
                                             n_hidden_layers=n_hidden_layers)

    out = fizzbuzz_forward(x, packed, n_hidden_layers=n_hidden_layers,
                           out_classes=out_classes_packed)
    out = jax.block_until_ready(out)

    ref = reference_forward(x, params, n_hidden_layers=n_hidden_layers)
    assert out.shape == (batch, out_classes)
    assert jnp.allclose(out, ref, atol=1e-4, rtol=1e-4)

    print("KERNEL_OK")
</pallas_src>

<mosaic_0001>
module attributes {stable_mosaic.version = 11 : i64} {
  func.func @fizzbuzz_kernel(%arg0: memref<8x16xf32, #tpu.memory_space<vmem>>, %arg1: memref<8x128xf32, #tpu.memory_space<vmem>>, %arg2: memref<16x32xf32, #tpu.memory_space<vmem>>, %arg3: memref<2x32x32xf32, #tpu.memory_space<vmem>>, %arg4: memref<32x128xf32, #tpu.memory_space<vmem>>, %arg5: memref<8x128xf32, #tpu.memory_space<vmem>>) attributes {dimension_semantics = [], scalar_prefetch = 0 : i64, scratch_operands = 0 : i64, tpu.core_type = #tpu.core_type<tc>} {
    %c0 = arith.constant 0 : index
    %c0_0 = arith.constant 0 : index
    %0 = vector.load %arg1[%c0, %c0_0] : memref<8x128xf32, #tpu.memory_space<vmem>>, vector<1x32xf32>
    %c0_1 = arith.constant 0 : index
    %c0_2 = arith.constant 0 : index
    %1 = vector.load %arg0[%c0_1, %c0_2] : memref<8x16xf32, #tpu.memory_space<vmem>>, vector<8x16xf32>
    %c0_3 = arith.constant 0 : index
    %c0_4 = arith.constant 0 : index
    %2 = vector.load %arg2[%c0_3, %c0_4] : memref<16x32xf32, #tpu.memory_space<vmem>>, vector<16x32xf32>
    %cst = arith.constant dense<0.000000e+00> : vector<8x32xf32>
    %3 = tpu.matmul %1, %2, %cst {dimension_numbers = #tpu.dot_dimension_numbers<[1], [0], [0], [1], [0, 0, 1, 1], [], []>} : vector<8x16xf32>, vector<16x32xf32>, vector<8x32xf32> -> vector<8x32xf32>
    %4 = vector.broadcast %0 : vector<1x32xf32> to vector<8x32xf32>
    %5 = arith.addf %3, %4 : vector<8x32xf32>
    %cst_5 = arith.constant 0.000000e+00 : f32
    %6 = vector.broadcast %cst_5 : f32 to vector<8x32xf32>
    %7 = arith.maximumf %5, %6 : vector<8x32xf32>
    %c1 = arith.constant 1 : index
    %c0_6 = arith.constant 0 : index
    %8 = vector.load %arg1[%c1, %c0_6] : memref<8x128xf32, #tpu.memory_space<vmem>>, vector<1x32xf32>
    %c3 = arith.constant 3 : index
    %c0_7 = arith.constant 0 : index
    %9 = vector.load %arg1[%c3, %c0_7] : memref<8x128xf32, #tpu.memory_space<vmem>>, vector<1x32xf32>
    %c5 = arith.constant 5 : index
    %c0_8 = arith.constant 0 : index
    %10 = vector.load %arg1[%c5, %c0_8] : memref<8x128xf32, #tpu.memory_space<vmem>>, vector<1x32xf32>
    %c0_9 = arith.constant 0 : index
    %c0_10 = arith.constant 0 : index
    %c0_11 = arith.constant 0 : index
    %11 = vector.load %arg3[%c0_9, %c0_10, %c0_11] : memref<2x32x32xf32, #tpu.memory_space<vmem>>, vector<1x32x32xf32>
    %12 = vector.shape_cast %11 : vector<1x32x32xf32> to vector<32x32xf32>
    %cst_12 = arith.constant dense<0.000000e+00> : vector<8x32xf32>
    %13 = tpu.matmul %7, %12, %cst_12 {dimension_numbers = #tpu.dot_dimension_numbers<[1], [0], [0], [1], [0, 0, 1, 1], [], []>} : vector<8x32xf32>, vector<32x32xf32>, vector<8x32xf32> -> vector<8x32xf32>
    %14 = vector.broadcast %8 : vector<1x32xf32> to vector<8x32xf32>
    %15 = arith.addf %13, %14 : vector<8x32xf32>
    %cst_13 = arith.constant dense<0.000000e+00> : vector<32xf32>
    %16 = vector.multi_reduction <add>, %15, %cst_13 [0] : vector<8x32xf32> to vector<32xf32>
    %17 = vector.shape_cast %16 : vector<32xf32> to vector<1x32xf32>
    %cst_14 = arith.constant 8.000000e+00 : f32
    %18 = vector.broadcast %cst_14 : f32 to vector<1x32xf32>
    %19 = arith.divf %17, %18 : vector<1x32xf32>
    %20 = vector.broadcast %19 : vector<1x32xf32> to vector<8x32xf32>
    %21 = arith.subf %15, %20 : vector<8x32xf32>
    %22 = arith.mulf %21, %21 : vector<8x32xf32>
    %cst_15 = arith.constant dense<0.000000e+00> : vector<32xf32>
    %23 = vector.multi_reduction <add>, %22, %cst_15 [0] : vector<8x32xf32> to vector<32xf32>
    %24 = vector.shape_cast %23 : vector<32xf32> to vector<1x32xf32>
    %cst_16 = arith.constant 8.000000e+00 : f32
    %25 = vector.broadcast %cst_16 : f32 to vector<1x32xf32>
    %26 = arith.divf %24, %25 : vector<1x32xf32>
    %cst_17 = arith.constant 9.99999974E-6 : f32
    %27 = vector.broadcast %cst_17 : f32 to vector<1x32xf32>
    %28 = arith.addf %26, %27 : vector<1x32xf32>
    %29 = math.rsqrt %28 : vector<1x32xf32>
    %30 = arith.mulf %9, %29 : vector<1x32xf32>
    %31 = arith.mulf %19, %30 : vector<1x32xf32>
    %32 = arith.subf %10, %31 : vector<1x32xf32>
    %33 = vector.broadcast %30 : vector<1x32xf32> to vector<8x32xf32>
    %34 = arith.mulf %15, %33 : vector<8x32xf32>
    %35 = vector.broadcast %32 : vector<1x32xf32> to vector<8x32xf32>
    %36 = arith.addf %34, %35 : vector<8x32xf32>
    %cst_18 = arith.constant 0.000000e+00 : f32
    %37 = vector.broadcast %cst_18 : f32 to vector<8x32xf32>
    %38 = arith.maximumf %36, %37 : vector<8x32xf32>
    %c2 = arith.constant 2 : index
    %c0_19 = arith.constant 0 : index
    %39 = vector.load %arg1[%c2, %c0_19] : memref<8x128xf32, #tpu.memory_space<vmem>>, vector<1x32xf32>
    %c4 = arith.constant 4 : index
    %c0_20 = arith.constant 0 : index
    %40 = vector.load %arg1[%c4, %c0_20] : memref<8x128xf32, #tpu.memory_space<vmem>>, vector<1x32xf32>
    %c6 = arith.constant 6 : index
    %c0_21 = arith.constant 0 : index
    %41 = vector.load %arg1[%c6, %c0_21] : memref<8x128xf32, #tpu.memory_space<vmem>>, vector<1x32xf32>
    %c1_22 = arith.constant 1 : index
    %c0_23 = arith.constant 0 : index
    %c0_24 = arith.constant 0 : index
    %42 = vector.load %arg3[%c1_22, %c0_23, %c0_24] : memref<2x32x32xf32, #tpu.memory_space<vmem>>, vector<1x32x32xf32>
    %43 = vector.shape_cast %42 : vector<1x32x32xf32> to vector<32x32xf32>
    %cst_25 = arith.constant dense<0.000000e+00> : vector<8x32xf32>
    %44 = tpu.matmul %38, %43, %cst_25 {dimension_numbers = #tpu.dot_dimension_numbers<[1], [0], [0], [1], [0, 0, 1, 1], [], []>} : vector<8x32xf32>, vector<32x32xf32>, vector<8x32xf32> -> vector<8x32xf32>
    %45 = vector.broadcast %39 : vector<1x32xf32> to vector<8x32xf32>
    %46 = arith.addf %44, %45 : vector<8x32xf32>
    %cst_26 = arith.constant dense<0.000000e+00> : vector<32xf32>
    %47 = vector.multi_reduction <add>, %46, %cst_26 [0] : vector<8x32xf32> to vector<32xf32>
    %48 = vector.shape_cast %47 : vector<32xf32> to vector<1x32xf32>
    %cst_27 = arith.constant 8.000000e+00 : f32
    %49 = vector.broadcast %cst_27 : f32 to vector<1x32xf32>
    %50 = arith.divf %48, %49 : vector<1x32xf32>
    %51 = vector.broadcast %50 : vector<1x32xf32> to vector<8x32xf32>
    %52 = arith.subf %46, %51 : vector<8x32xf32>
    %53 = arith.mulf %52, %52 : vector<8x32xf32>
    %cst_28 = arith.constant dense<0.000000e+00> : vector<32xf32>
    %54 = vector.multi_reduction <add>, %53, %cst_28 [0] : vector<8x32xf32> to vector<32xf32>
    %55 = vector.shape_cast %54 : vector<32xf32> to vector<1x32xf32>
    %cst_29 = arith.constant 8.000000e+00 : f32
    %56 = vector.broadcast %cst_29 : f32 to vector<1x32xf32>
    %57 = arith.divf %55, %56 : vector<1x32xf32>
    %cst_30 = arith.constant 9.99999974E-6 : f32
    %58 = vector.broadcast %cst_30 : f32 to vector<1x32xf32>
    %59 = arith.addf %57, %58 : vector<1x32xf32>
    %60 = math.rsqrt %59 : vector<1x32xf32>
    %61 = arith.mulf %40, %60 : vector<1x32xf32>
    %62 = arith.mulf %50, %61 : vector<1x32xf32>
    %63 = arith.subf %41, %62 : vector<1x32xf32>
    %64 = vector.broadcast %61 : vector<1x32xf32> to vector<8x32xf32>
    %65 = arith.mulf %46, %64 : vector<8x32xf32>
    %66 = vector.broadcast %63 : vector<1x32xf32> to vector<8x32xf32>
    %67 = arith.addf %65, %66 : vector<8x32xf32>
    %cst_31 = arith.constant 0.000000e+00 : f32
    %68 = vector.broadcast %cst_31 : f32 to vector<8x32xf32>
    %69 = arith.maximumf %67, %68 : vector<8x32xf32>
    %c7 = arith.constant 7 : index
    %c0_32 = arith.constant 0 : index
    %70 = vector.load %arg1[%c7, %c0_32] : memref<8x128xf32, #tpu.memory_space<vmem>>, vector<1x128xf32>
    %c0_33 = arith.constant 0 : index
    %c0_34 = arith.constant 0 : index
    %71 = vector.load %arg4[%c0_33, %c0_34] : memref<32x128xf32, #tpu.memory_space<vmem>>, vector<32x128xf32>
    %cst_35 = arith.constant dense<0.000000e+00> : vector<8x128xf32>
    %72 = tpu.matmul %69, %71, %cst_35 {dimension_numbers = #tpu.dot_dimension_numbers<[1], [0], [0], [1], [0, 0, 1, 1], [], []>} : vector<8x32xf32>, vector<32x128xf32>, vector<8x128xf32> -> vector<8x128xf32>
    %73 = vector.broadcast %70 : vector<1x128xf32> to vector<8x128xf32>
    %74 = arith.addf %72, %73 : vector<8x128xf32>
    %c0_36 = arith.constant 0 : index
    %c0_37 = arith.constant 0 : index
    %75 = vector.load %arg5[%c0_36, %c0_37] : memref<8x128xf32, #tpu.memory_space<vmem>>, vector<8x128xf32>
    tpu.vector_store %arg5[%c0_36, %c0_37], %74 {strides = array<i32>} : memref<8x128xf32, #tpu.memory_space<vmem>>, vector<8x128xf32>,
    return
  }
}

</mosaic_0001>

<bundles_post_ra>
// kernel: tpu_custom_call.1
= control target key start
LH: loop header
LB: loop body
LE: loop exit
PB: predicated region body
PF: predicated region fallthrough
CT: control target
= control target key end

     0   :  { %10 = vsyncpa [#allocation3], 0  ;;  %s811_s0 = inlined_call_operand.hbm [shape: f32[8,16], index: 0, kind: input, shape index: {}]   ;;  %s812_s1 = inlined_call_operand.hbm [shape: f32[8,128], index: 1, kind: input, shape index: {}]   ;;  %s813_s2 = inlined_call_operand.hbm [shape: f32[16,32], index: 2, kind: input, shape index: {}]   ;;  %s814_s3 = inlined_call_operand.hbm [shape: f32[2,32,32], index: 3, kind: input, shape index: {}]   ;;  %s815_s4 = inlined_call_operand.hbm [shape: f32[32,128], index: 4, kind: input, shape index: {}]   ;;  %s816_s5 = inlined_call_operand.hbm [shape: f32[8,128], index: 5, kind: output, shape index: {}]  }
   0x1   :  { %11 = vsyncpa [#allocation6], 0 }
   0x2   :  { %12 = vsyncpa [#allocation9], 0 }
   0x3   :  { %13 = vsyncpa [#allocation4], 0  ;;  %s715_s18 = smov [#allocation5]  }
   0x4   :  { %s30_s19 = sshll.u32 %s715_s18, 4  ;;  %s31_s19 = int_to_ptr.vmem [resolvable:$true] %s30_s19 }
   0x5   :  { %s595_s20 = scalar_lea.vmem %s31_s19, 128  ;;  %p600_p1 = scmp.lt.s32.totalorder %s31_s19, %s31_s19 }
   0x6   :  { %p596_p0 = scmp.ne.s32.totalorder %s31_s19, %s595_s20  ;;  %p601_p2 = scmp.lt.s32.totalorder %s595_s20, %s595_s20 }
   0x8   :  { %p602_p3 = por %p601_p2, %p600_p1 }
   0xa   :  { %p603_p4 = pnand %p602_p3, %p596_p0 }
   0xc   :  { %606 = shalt.err (!%p603_p4)
}
   0xd   :  { %33 = dma.hbm_to_vmem [thread:$0]  %s812_s1, 128, %s31_s19, [#allocation6]  }
   0xe   :  { %s716_s23 = smov [#allocation8]   ;;  %s717_s25 = smov [#allocation2]  }
   0xf   :  { %s51_s24 = sshll.u32 %s716_s23, 4  ;;  %s20_s26 = sshll.u32 %s717_s25, 4  ;;  %s52_s24 = int_to_ptr.vmem [resolvable:$true] %s51_s24  ;;  %s21_s26 = int_to_ptr.vmem [resolvable:$true] %s20_s26 }
  0x10   :  { %s615_s27 = scalar_lea.vmem %s52_s24, 1024  ;;  %p620_p6 = scmp.lt.s32.totalorder %s52_s24, %s52_s24 }
  0x11   :  { %p616_p5 = scmp.ne.s32.totalorder %s52_s24, %s615_s27  ;;  %p621_p7 = scmp.lt.s32.totalorder %s615_s27, %s615_s27 }
  0x13   :  { %p622_p8 = por %p621_p7, %p620_p6 }
  0x15   :  { %p623_p9 = pnand %p622_p8, %p616_p5 }
  0x17   :  { %626 = shalt.err (!%p623_p9)
}
  0x18   :  { %s718_s28 = smov 128   ;;  %s719_s29 = smov 8  }
  0x19   :  { %57 = dma.hbm_to_vmem [thread:$0]  %s814_s3, 1024, %s52_s24, [#allocation9], %s718_s28, %s718_s28, %s719_s29  }
  0x1a   :  { %s635_s1 = scalar_lea.vmem %s21_s26, 128  ;;  %p640_p11 = scmp.lt.s32.totalorder %s21_s26, %s21_s26 }
  0x1b   :  { %p636_p10 = scmp.ne.s32.totalorder %s21_s26, %s635_s1  ;;  %p641_p12 = scmp.lt.s32.totalorder %s635_s1, %s635_s1 }
  0x1d   :  { %p642_p13 = por %p641_p12, %p640_p11 }
  0x1f   :  { %p643_p0 = pnand %p642_p13, %p636_p10 }
  0x21   :  { %646 = shalt.err (!%p643_p0)
}
  0x22   :  { %23 = dma.hbm_to_vmem [thread:$0]  %s811_s0, 128, %s21_s26, [#allocation3]  }
  0x23   :  { %s720_s9 = smov [#allocation7]   ;;  %s721_s11 = smov [#allocation10]  }
  0x24   :  { %s39_s10 = sshll.u32 %s720_s9, 4  ;;  %s63_s12 = sshll.u32 %s721_s11, 4  ;;  %s40_s10 = int_to_ptr.vmem [resolvable:$true] %s39_s10  ;;  %s64_s12 = int_to_ptr.vmem [resolvable:$true] %s63_s12 }
  0x25   :  { %s655_s13 = scalar_lea.vmem %s40_s10, 256  ;;  %p660_p2 = scmp.lt.s32.totalorder %s40_s10, %s40_s10 }
  0x26   :  { %p656_p1 = scmp.ne.s32.totalorder %s40_s10, %s655_s13  ;;  %p661_p3 = scmp.lt.s32.totalorder %s655_s13, %s655_s13 }
  0x28   :  { %p662_p4 = por %p661_p3, %p660_p2 }
  0x2a   :  { %p663_p5 = pnand %p662_p4, %p656_p1 }
  0x2c   :  { %666 = shalt.err (!%p663_p5)
}
  0x2d   :  { %45 = dma.hbm_to_vmem [thread:$0]  %s813_s2, 256, %s40_s10, [#allocation6], %s718_s28, %s718_s28, %s719_s29  }
  0x2e   :  { %s675_s0 = scalar_lea.vmem %s64_s12, 512  ;;  %p680_p7 = scmp.lt.s32.totalorder %s64_s12, %s64_s12 }
  0x2f   :  { %p676_p6 = scmp.ne.s32.totalorder %s64_s12, %s675_s0  ;;  %p681_p8 = scmp.lt.s32.totalorder %s675_s0, %s675_s0 }
  0x31   :  { %p682_p9 = por %p681_p8, %p680_p7 }
  0x33   :  { %p683_p10 = pnand %p682_p9, %p676_p6 }
  0x35   :  { %686 = shalt.err (!%p683_p10)
}
  0x36   :  { %69 = dma.hbm_to_vmem [thread:$0]  %s815_s4, 512, %s64_s12, [#allocation9], %s718_s28, %s718_s28, %s719_s29  }
  0x37   :  { %707 = dma.done.wait [#allocation3], 128  }
  0x38   :  { %708 = vsyncadd [#allocation3], 4294967168 }
  0x39   :  { %709 = dma.done.wait [#allocation6], 384  }
  0x3a   :  { %710 = vsyncadd [#allocation6], 4294966912 }
  0x3b   :  { %711 = dma.done.wait [#allocation9], 1536  }
  0x3c   :  { %712 = vsyncadd [#allocation9], 4294965760  ;;  %v722_v0 = vmov 0.0   ;;  %vm723_vm0 = vmmov 0   ;;  %v88_v1 = vld [vmem:[#allocation7 + $0x8] sm:$0xff]  ;;  %v87_v2 = vld [vmem:[#allocation7] sm:$0xff]  ;;  %v277_v40 = vlaneseq }
  0x3d   :  { %533 = vmatprep.subr.mxu0 %v722_v0  ;;  %537 = vmatprep.mubr.msk.f32.mxu0 %vm723_vm0, %v722_v0  ;;  %v86_v3 = vld [vmem:[#allocation2] sm:$0xff]  ;;  %vm93_vm1 = vcmask 130048   ;;  %v174_v4 = vld [vmem:[#allocation8 + $0x18] sm:$0xff]  ;;  %v173_v5 = vld [vmem:[#allocation8 + $0x10] sm:$0xff]  ;;  %vm179_vm2 = vcmask 261120   ;;  %s724_s2 = smov [#allocation11]  }
  0x3e   :  { %540 = vmatprep.subr.mxu1 %v722_v0  ;;  %548 = vmatprep.mubr.msk.f32.mxu1 %vm723_vm0, %v722_v0  ;;  %v172_v6 = vld [vmem:[#allocation8 + $0x8] sm:$0xff]  ;;  %v171_v7 = vld [vmem:[#allocation8] sm:$0xff]  ;;  %v295_v13 = vld [vmem:[#allocation8 + $0x38] sm:$0xff]  ;;  %v278_v41 = vshrl.u32 %v277_v40, 7  ;;  %s496_s4 = sshll.u32 %s724_s2, 4  ;;  %s497_s4 = int_to_ptr.vmem [resolvable:$true] %s496_s4 }
  0x3f   :  { %534 = vmatpush3.msra.mxu0 %v88_v1  ;;  %541 = vmatpush3.msra.mxu1 %v174_v4  ;;  %v507_v8 = vld [vmem:[#allocation5] ss:$0 sm:$0xff]  ;;  %v294_v14 = vld [vmem:[#allocation8 + $0x30] sm:$0xff]  ;;  %v292_v16 = vld [vmem:[#allocation8 + $0x20] sm:$0xff]  ;;  %s687_s17 = scalar_lea.vmem %s497_s4, 128  ;;  %p692_p12 = scmp.lt.s32.totalorder %s497_s4, %s497_s4 }
  0x40   :  { %535 = vmatprep.subr.mxu0 %v722_v0  ;;  %542 = vmatprep.subr.mxu1 %v722_v0  ;;  %v293_v15 = vld [vmem:[#allocation8 + $0x28] sm:$0xff]  ;;  %v279_v43 = vsub.s32 0, %v278_v41  ;;  %v411_v54 = vld [vmem:[#allocation10 + $0x18] sm:$0xff]  ;;  %v410_v55 = vld [vmem:[#allocation10 + $0x10] sm:$0xff]  ;;  %p688_p11 = scmp.ne.s32.totalorder %s497_s4, %s687_s17  ;;  %p693_p13 = scmp.lt.s32.totalorder %s687_s17, %s687_s17 }
  0x41   :  { %536 = vmatpush3.msra.mxu0 %v87_v2  ;;  %543 = vmatpush3.msra.mxu1 %v173_v5  ;;  %v509_v17 = vld [vmem:[#allocation5 + $0x1] ss:$0 sm:$0xff]  ;;  %v169_v42 = vld [vmem:[#allocation5 + $0x3] sm:$0x1]  ;;  %v170_v46 = vld [vmem:[#allocation5 + $0x5] sm:$0x1] }
  0x42   :  { %538 = vmatmul.mubr.msk.f32.vlgmr.msra.gmra.mxu0 %vm93_vm1, %v86_v3  ;;  %551 = vmatprep.subr.mxu0 %v722_v0  ;;  %v409_v56 = vld [vmem:[#allocation10 + $0x8] sm:$0xff]  ;;  %v408_v57 = vld [vmem:[#allocation10] sm:$0xff]  ;;  %p694_p0 = por %p693_p13, %p692_p12 }
  0x43   :  { %559 = vmatprep.mubr.msk.f32.mxu0 %vm723_vm0, %v722_v0  ;;  %544 = vmatprep.subr.mxu1 %v722_v0  ;;  %v511_v58 = vld [vmem:[#allocation5 + $0x2] ss:$0 sm:$0xff] }
  0x44   :  { %545 = vmatpush3.msra.mxu1 %v172_v6  ;;  %552 = vmatpush3.msra.mxu0 %v295_v13  ;;  %p695_p1 = pnand %p694_p0, %p688_p11 }
  0x45   :  { %546 = vmatprep.subr.mxu1 %v722_v0  ;;  %553 = vmatprep.subr.mxu0 %v722_v0 }
  0x46   :  { %547 = vmatpush3.msra.mxu1 %v171_v7  ;;  %554 = vmatpush3.msra.mxu0 %v294_v14 }
  0x47   :  { %562 = vmatprep.subr.mxu1 %v722_v0  ;;  %555 = vmatprep.subr.mxu0 %v722_v0 }
  0x48   :  { %556 = vmatpush3.msra.mxu0 %v293_v15 }
  0x49   :  { %557 = vmatprep.subr.mxu0 %v722_v0 }
  0x4a   :  { %558 = vmatpush3.msra.mxu0 %v292_v16 }
 0x102   :  { %v163_v9 = vpop.f32.mrf.mxu0 }
 0x103   :  { %v164_v10 = vadd.f32 %v507_v8, %v163_v9 }
 0x104   :  { %v539_v11 = vpop.f32.mrf.mxu0 }
 0x105   :  { %v167_v12 = vmax.f32 %v164_v10, 0.0 }
 0x107   :  { %549 = vmatmul.mubr.msk.f32.vlgmr.msra.gmra.mxu1 %vm179_vm2, %v167_v12 }
 0x108   :  { %570 = vmatprep.mubr.msk.f32.mxu1 %vm723_vm0, %v722_v0  ;;  %563 = vmatpush3.msra.mxu1 %v411_v54 }
 0x109   :  { %564 = vmatprep.subr.mxu1 %v722_v0 }
 0x10a   :  { %565 = vmatpush3.msra.mxu1 %v410_v55 }
 0x10b   :  { %566 = vmatprep.subr.mxu1 %v722_v0 }
 0x10c   :  { %567 = vmatpush3.msra.mxu1 %v409_v56 }
 0x10d   :  { %568 = vmatprep.subr.mxu1 %v722_v0 }
 0x10e   :  { %569 = vmatpush3.msra.mxu1 %v408_v57 }
 0x1c7   :  { %v249_v18 = vpop.f32.mrf.mxu1 }
 0x1c8   :  { %v250_v19 = vadd.f32 %v509_v17, %v249_v18  ;;  %v289_v17 = vld [vmem:[#allocation5 + $0x4] sm:$0x1] }
 0x1c9   :  { %v550_v20 = vpop.f32.mrf.mxu1 }
 0x1ca   :  { %v253_v21 = vsel %vm179_vm2, %v250_v19, 0.0  ;;  %v290_v20 = vld [vmem:[#allocation5 + $0x6] sm:$0x1] }
 0x1cb   :  { %v254_v22 = vrot.slane %v253_v21, 4 }
 0x1cd   :  { %v255_v23 = vadd.f32 %v254_v22, %v253_v21 }
 0x1cf   :  { %v256_v24 = vrot.slane %v255_v23, 2 }
 0x1d1   :  { %v257_v25 = vadd.f32 %v256_v24, %v255_v23 }
 0x1d3   :  { %v258_v26 = vrot.slane %v257_v25, 1 }
 0x1d5   :  { %v259_v27 = vadd.f32 %v258_v26, %v257_v25 }
 0x1d7   :  { %v261_v28 = vmul.f32 0.125, %v259_v27 }
 0x1d9   :  { %v262_v29 = vsub.f32 %v250_v19, %v261_v28 }
 0x1db   :  { %v263_v30 = vmul.f32 %v262_v29, %v262_v29 }
 0x1dd   :  { %v264_v31 = vsel %vm179_vm2, %v263_v30, 0.0 }
 0x1de   :  { %v265_v32 = vrot.slane %v264_v31, 4 }
 0x1e0   :  { %v266_v33 = vadd.f32 %v265_v32, %v264_v31 }
 0x1e2   :  { %v267_v34 = vrot.slane %v266_v33, 2 }
 0x1e4   :  { %v268_v35 = vadd.f32 %v267_v34, %v266_v33 }
 0x1e6   :  { %v269_v36 = vrot.slane %v268_v35, 1 }
 0x1e8   :  { %v270_v37 = vadd.f32 %v269_v36, %v268_v35 }
 0x1ea   :  { %v271_v38 = vmul.f32 0.125, %v270_v37 }
 0x1ec   :  { %v272_v39 = vadd.f32 1e-05, %v271_v38 }
 0x1ee   :  { %583 = vrsqrt.f32 %v272_v39 }
 0x1fb   :  { %v584_v44 = vpop.eup %583 }
 0x1fc   :  { %v274_v45 = vmul.f32 %v584_v44, %v169_v42 }
 0x1fe   :  { %v275_v47 = vmul.f32 %v274_v45, %v261_v28  ;;  %v280_v48 = vrot.slane %v274_v45, %v279_v43  ;;  %v513_v28 = vld [vmem:[#allocation5 + $0x7] ss:$0 sm:$0xff] }
 0x200   :  { %v276_v49 = vsub.f32 %v170_v46, %v275_v47  ;;  %v281_v50 = vmul.f32 %v280_v48, %v250_v19 }
 0x202   :  { %v285_v51 = vrot.slane %v276_v49, %v279_v43 }
 0x204   :  { %v286_v52 = vadd.f32 %v285_v51, %v281_v50 }
 0x206   :  { %v287_v53 = vmax.f32 %v286_v52, 0.0 }
 0x208   :  { %560 = vmatmul.mubr.msk.f32.vlgmr.msra.gmra.mxu0 %vm179_vm2, %v287_v53 }
 0x2c8   :  { %v369_v59 = vpop.f32.mrf.mxu0 }
 0x2c9   :  { %v370_v60 = vadd.f32 %v511_v58, %v369_v59 }
 0x2ca   :  { %v561_v61 = vpop.f32.mrf.mxu0 }
 0x2cb   :  { %v373_v62 = vsel %vm179_vm2, %v370_v60, 0.0 }
 0x2cc   :  { %v374_v63 = vrot.slane %v373_v62, 4 }
 0x2ce   :  { %v375_v1 = vadd.f32 %v374_v63, %v373_v62 }
 0x2d0   :  { %v376_v2 = vrot.slane %v375_v1, 2 }
 0x2d2   :  { %v377_v3 = vadd.f32 %v376_v2, %v375_v1 }
 0x2d4   :  { %v378_v4 = vrot.slane %v377_v3, 1 }
 0x2d6   :  { %v379_v5 = vadd.f32 %v378_v4, %v377_v3 }
 0x2d8   :  { %v380_v6 = vmul.f32 0.125, %v379_v5 }
 0x2da   :  { %v381_v7 = vsub.f32 %v370_v60, %v380_v6 }
 0x2dc   :  { %v382_v8 = vmul.f32 %v381_v7, %v381_v7 }
 0x2de   :  { %v383_v9 = vsel %vm179_vm2, %v382_v8, 0.0 }
 0x2df   :  { %v384_v0 = vrot.slane %v383_v9, 4 }
 0x2e1   :  { %v385_v10 = vadd.f32 %v384_v0, %v383_v9 }
 0x2e3   :  { %v386_v11 = vrot.slane %v385_v10, 2 }
 0x2e5   :  { %v387_v12 = vadd.f32 %v386_v11, %v385_v10 }
 0x2e7   :  { %v388_v13 = vrot.slane %v387_v12, 1 }
 0x2e9   :  { %v389_v14 = vadd.f32 %v388_v13, %v387_v12 }
 0x2eb   :  { %v390_v15 = vmul.f32 0.125, %v389_v14 }
 0x2ed   :  { %v391_v16 = vadd.f32 1e-05, %v390_v15 }
 0x2ef   :  { %585 = vrsqrt.f32 %v391_v16 }
 0x2fc   :  { %v586_v18 = vpop.eup %585 }
 0x2fd   :  { %v393_v19 = vmul.f32 %v586_v18, %v289_v17 }
 0x2ff   :  { %v394_v21 = vmul.f32 %v393_v19, %v380_v6  ;;  %v399_v22 = vrot.slane %v393_v19, %v279_v43 }
 0x301   :  { %v395_v23 = vsub.f32 %v290_v20, %v394_v21  ;;  %v400_v24 = vmul.f32 %v399_v22, %v370_v60 }
 0x303   :  { %v404_v25 = vrot.slane %v395_v23, %v279_v43 }
 0x305   :  { %v405_v26 = vadd.f32 %v404_v25, %v400_v24 }
 0x307   :  { %v406_v27 = vmax.f32 %v405_v26, 0.0 }
 0x309   :  { %571 = vmatmul.mubr.msk.f32.vlgmr.msra.gmra.mxu1 %vm179_vm2, %v406_v27 }
 0x3c9   :  { %v485_v29 = vpop.f32.mrf.mxu1 }
 0x3ca   :  { %v486_v30 = vadd.f32 %v513_v28, %v485_v29 }
 0x3cb   :  { %v572_v31 = vpop.f32.mrf.mxu1 }
 0x3cc   :  { %489 = vst [vmem:[#allocation11] sm:$0xff] %v486_v30 }
 0x3cd   :  { %698 = shalt.err (!%p695_p1)
}
 0x3ce   :  { %499 = dma.vmem_to_hbm [thread:$0]  %s497_s4, 128, %s816_s5, [#allocation4]  }
 0x3cf   :  { %713 = dma.done.wait [#allocation4], 128  }
 0x3d0   :  { %714 = vsyncadd [#allocation4], 4294967168 }
 0x3d1   :  { %503 = vsyncpa [#allocation3], 1 }
 0x3d2   :  { %504 = vsyncpa [#allocation6], 1 }
 0x3d3   :  { %505 = vsyncpa [#allocation9], 1 }
 0x3d4   :  { %506 = vsyncpa [#allocation4], 1 }

</bundles_post_ra>
